<compile_context>
chip_gen: v7x
topology: tpu7x:2x2x1
jax: 0.10.0
libtpu: 0.0.40
codegen_flags: <defaults>
</compile_context>

<pallas_src>
import jax
import jax.numpy as jnp
from jax.experimental import pallas as pl
from jax.experimental.pallas import tpu as pltpu


# ---------------------------------------------------------------------------
# Kernel
# ---------------------------------------------------------------------------
def _make_kernel(Cin, Cout, kH, kW):
    def widx(ci, co, kh, kw):            # flat index into weight.reshape(-1)
        return ((ci * Cout + co) * kH + kh) * kW + kw

    def kernel(w_ref, b_ref, x_ref, e_ref, o_ref):
        # w_ref : SMEM (Cin*Cout*kH*kW,) f32  -- scalar-prefetched conv weights
        # b_ref : SMEM (Cout,)           f32  -- scalar-prefetched bias
        # x_ref : VMEM (1, Cin, TH, W)        -- NCHW row tile (W in lanes)
        # e_ref : VMEM (kW*W, kW*W)           -- kw-interleave permutation (resident)
        # o_ref : VMEM (1, Cout, TH, kH*kW*W) -- folded-NCHW output row tile
        xs = [x_ref[0, ci] for ci in range(Cin)]          # Cin x (TH, W) planes
        e = e_ref[...]                                    # hoisted, reused by all dots
        for co in range(Cout):                            # small & static -> unrolled
            kh_rows = []
            for kh in range(kH):
                planes = []
                for kw in range(kW):
                    # dense channel mix: contraction depth Cin on the VPU
                    # (NCHW keeps Cin in the major dim -> no relayout needed)
                    acc = xs[0] * w_ref[widx(0, co, kh, kw)]
                    for ci in range(1, Cin):
                        acc = acc + xs[ci] * w_ref[widx(ci, co, kh, kw)]
                    planes.append(acc)
                # kw lane-interleave on the MXU via the tiny permutation matrix
                pcat = jnp.concatenate(planes, axis=-1)   # (TH, kW*W)
                kh_rows.append(jnp.dot(pcat, e, preferred_element_type=jnp.float32))
            # per-channel slab streamed out immediately (no full-width accumulator)
            out_co = jnp.concatenate(kh_rows, axis=-1) + b_ref[co]   # (TH, kH*kW*W)
            o_ref[0, co] = out_co.astype(o_ref.dtype)
    return kernel


# ---------------------------------------------------------------------------
# VMEM budgeting / tiling helpers
# ---------------------------------------------------------------------------
def _vmem_cap_bytes():
    """~75% of physical VMEM when discoverable; conservative 48 MiB otherwise
    (safe on v7x's 64 MiB as well as v5e/v6e's 128 MiB)."""
    try:
        cap = int(pltpu.get_tpu_info().vmem_capacity_bytes) * 3 // 4
        return max(min(cap, 100 * 1024 * 1024), 16 * 1024 * 1024)
    except Exception:
        return 48 * 1024 * 1024


def _pick_row_tile(N, H, W, Cin, Cout, kH, kW, budget_bytes):
    """Largest multiple-of-8 row tile whose double-buffered input + output
    blocks fit the VMEM budget; keeps >= 2 grid steps when the batch axis
    alone cannot feed both TensorCores (v7x)."""
    OW = kH * kW * W
    per_row = 4 * (2 * Cin * W + 2 * Cout * OW)        # dbl-buffered in+out, f32
    fixed = 4 * (kW * W) ** 2 + (2 << 20)              # resident interleave mat + slack
    avail = max(budget_bytes - fixed, 8 * per_row)
    th = max((int(avail // per_row) // 8) * 8, 8)
    if th >= H:
        th = H                                         # full-height block is always legal
    if N == 1 and th == H and H >= 16:
        th = max(((H // 2) // 8) * 8, 8)               # keep >= 2 grid steps
    return th


def _resident_spec(block_shape, index_map):
    """BlockSpec for a grid-constant block: single-buffered when supported."""
    try:
        return pl.BlockSpec(block_shape, index_map, pipeline_mode=pl.Buffered(1))
    except Exception:                                  # older jax: no pipeline_mode
        return pl.BlockSpec(block_shape, index_map)


# ---------------------------------------------------------------------------
# Forward pass
# ---------------------------------------------------------------------------
def upsample_forward(x_nchw, weight, bias):
    """ConvTranspose2d(k=2, s=2, p=0) forward, matching the PyTorch module.

    x_nchw : (N, Cin, H, W) float32
    weight : (Cin, Cout, kH, kW) float32  (module stores [out, in, k, k] but the
             op reads it as [in, out, k, k]; in == out for the module)
    bias   : (Cout,) float32
    returns: (N, Cout, kH*H, kW*W) float32
    """
    N, Cin, H, W = x_nchw.shape
    Ci_w, Cout, kH, kW = weight.shape
    assert Ci_w == Cin, "module only runs when in_chans == out_chans"

    kWW = kW * W
    OW = kH * kWW                       # folded output row length per channel

    # kw-interleave permutation: E[kw*W + w, kW*w + kw] = 1.  Weight-independent,
    # 4*(kW*W)^2 bytes (4 MiB at W=512), VMEM-resident, single-buffered.
    r = jnp.arange(kWW)
    cols = (r % W) * kW + (r // W)
    e_mat = (cols[:, None] == jnp.arange(kWW)[None, :]).astype(jnp.float32)

    w_flat = weight.astype(jnp.float32).reshape(-1)     # tiny -> SMEM scalars
    b_vec = bias.astype(jnp.float32)

    cap = _vmem_cap_bytes()
    TH = _pick_row_tile(N, H, W, Cin, Cout, kH, kW, cap - (4 << 20))
    grid = (N, -(-H // TH))                             # cdiv: ragged last tile masked

    kernel = _make_kernel(Cin, Cout, kH, kW)

    y = pl.pallas_call(
        kernel,
        out_shape=jax.ShapeDtypeStruct((N, Cout, H, OW), jnp.float32),
        grid_spec=pltpu.PrefetchScalarGridSpec(
            num_scalar_prefetch=2,                      # weights + bias -> SMEM
            grid=grid,
            in_specs=[
                # streamed NCHW input row tiles (W in lanes)
                pl.BlockSpec((1, Cin, TH, W), lambda n, i, w, b: (n, 0, i, 0)),
                # VMEM-resident interleave matrix (constant index map)
                _resident_spec((kWW, kWW), lambda n, i, w, b: (0, 0)),
            ],
            out_specs=pl.BlockSpec((1, Cout, TH, OW), lambda n, i, w, b: (n, 0, i, 0)),
        ),
        compiler_params=pltpu.CompilerParams(
            dimension_semantics=("parallel", "parallel"),
            vmem_limit_bytes=int(cap)),
        cost_estimate=pl.CostEstimate(
            flops=2 * N * H * W * Cin * Cout * kH * kW          # channel mix
                  + 2 * N * H * Cout * kH * kWW * kWW,          # interleave matmul
            transcendentals=0,
            bytes_accessed=4 * (N * Cin * H * W + N * Cout * H * OW
                                + kWW * kWW + w_flat.size + Cout)),
    )(w_flat, b_vec, x_nchw.astype(jnp.float32), e_mat)

    # Pure contiguity-preserving reshape (free): (N, Cout, H, kH*kW*W) -> NCHW.
    return y.reshape(N, Cout, kH * H, kW * W)


# TODO(synk): save_plots()/intermediate_tensor/ground-truth bookkeeping is
# host-side I/O & plotting with no Pallas equivalent; only the forward pass is
# implemented.


if __name__ == "__main__":
    key = jax.random.PRNGKey(0)
    k_x, k_w, k_b = jax.random.split(key, 3)

    N, C, H, W = 2, 4, 16, 16          # in_chans == out_chans == 4 (see NOTE)
    kH = kW = 2

    x = jax.random.uniform(k_x, (N, C, H, W), dtype=jnp.float32)
    # module __init__: torch.rand([out_chans, in_chans, k, k]); the op reads it
    # as [in, out, k, k] -> here weight[ci, co, kh, kw]
    weight = jax.random.uniform(k_w, (C, C, kH, kW), dtype=jnp.float32)
    bias = jax.random.uniform(k_b, (C,), dtype=jnp.float32)

    fwd = jax.jit(upsample_forward)
    out = jax.block_until_ready(fwd(x, weight, bias))

    # pure-JAX reference (same math, no Pallas) for a sanity check
    ref = jnp.einsum("ncij,cdkl->ndikjl", x, weight)   # (N, Cout, H, kH, W, kW)
    ref = ref.reshape(N, C, H * kH, W * kW) + bias[None, :, None, None]

    assert out.shape == (N, C, H * kH, W * kW)
    assert jnp.allclose(out, ref, atol=1e-5, rtol=1e-5)

    print("KERNEL_OK")
</pallas_src>

<mosaic_0001>
module attributes {stable_mosaic.version = 11 : i64} {
  func.func @kernel(%arg0: i32, %arg1: i32, %arg2: memref<64xf32, #tpu.memory_space<smem>>, %arg3: memref<4xf32, #tpu.memory_space<smem>>, %arg4: memref<1x4x16x16xf32, #tpu.memory_space<vmem>>, %arg5: memref<32x32xf32, #tpu.memory_space<vmem>>, %arg6: memref<1x4x16x64xf32, #tpu.memory_space<vmem>>) attributes {dimension_semantics = [#tpu.dimension_semantics<parallel>, #tpu.dimension_semantics<parallel>], iteration_bounds = array<i64: 2, 1>, scalar_prefetch = 2 : i64, scratch_operands = 0 : i64, tpu.core_type = #tpu.core_type<tc>, window_params = [{transform_indices = @transform_0, window_bounds = array<i64: 1, 4, 16, 16>}, {pipeline_mode = #tpu.pipeline_mode<synchronous>, transform_indices = @transform_1, window_bounds = array<i64: 32, 32>}, {transform_indices = @transform_2, window_bounds = array<i64: 1, 4, 16, 64>}]} {
    %c0 = arith.constant 0 : index
    %c0_0 = arith.constant 0 : index
    %c0_1 = arith.constant 0 : index
    %c0_2 = arith.constant 0 : index
    %0 = vector.load %arg4[%c0, %c0_0, %c0_1, %c0_2] : memref<1x4x16x16xf32, #tpu.memory_space<vmem>>, vector<1x1x16x16xf32>
    %1 = vector.shape_cast %0 : vector<1x1x16x16xf32> to vector<16x16xf32>
    %c0_3 = arith.constant 0 : index
    %c1 = arith.constant 1 : index
    %c0_4 = arith.constant 0 : index
    %c0_5 = arith.constant 0 : index
    %2 = vector.load %arg4[%c0_3, %c1, %c0_4, %c0_5] : memref<1x4x16x16xf32, #tpu.memory_space<vmem>>, vector<1x1x16x16xf32>
    %3 = vector.shape_cast %2 : vector<1x1x16x16xf32> to vector<16x16xf32>
    %c0_6 = arith.constant 0 : index
    %c2 = arith.constant 2 : index
    %c0_7 = arith.constant 0 : index
    %c0_8 = arith.constant 0 : index
    %4 = vector.load %arg4[%c0_6, %c2, %c0_7, %c0_8] : memref<1x4x16x16xf32, #tpu.memory_space<vmem>>, vector<1x1x16x16xf32>
    %5 = vector.shape_cast %4 : vector<1x1x16x16xf32> to vector<16x16xf32>
    %c0_9 = arith.constant 0 : index
    %c3 = arith.constant 3 : index
    %c0_10 = arith.constant 0 : index
    %c0_11 = arith.constant 0 : index
    %6 = vector.load %arg4[%c0_9, %c3, %c0_10, %c0_11] : memref<1x4x16x16xf32, #tpu.memory_space<vmem>>, vector<1x1x16x16xf32>
    %7 = vector.shape_cast %6 : vector<1x1x16x16xf32> to vector<16x16xf32>
    %c0_12 = arith.constant 0 : index
    %c0_13 = arith.constant 0 : index
    %8 = vector.load %arg5[%c0_12, %c0_13] : memref<32x32xf32, #tpu.memory_space<vmem>>, vector<32x32xf32>
    %c0_14 = arith.constant 0 : index
    %9 = memref.load %arg2[%c0_14] : memref<64xf32, #tpu.memory_space<smem>>
    %10 = vector.broadcast %9 : f32 to vector<16x16xf32>
    %11 = arith.mulf %1, %10 : vector<16x16xf32>
    %c16 = arith.constant 16 : index
    %12 = memref.load %arg2[%c16] : memref<64xf32, #tpu.memory_space<smem>>
    %13 = vector.broadcast %12 : f32 to vector<16x16xf32>
    %14 = arith.mulf %3, %13 : vector<16x16xf32>
    %15 = arith.addf %11, %14 : vector<16x16xf32>
    %c32 = arith.constant 32 : index
    %16 = memref.load %arg2[%c32] : memref<64xf32, #tpu.memory_space<smem>>
    %17 = vector.broadcast %16 : f32 to vector<16x16xf32>
    %18 = arith.mulf %5, %17 : vector<16x16xf32>
    %19 = arith.addf %15, %18 : vector<16x16xf32>
    %c48 = arith.constant 48 : index
    %20 = memref.load %arg2[%c48] : memref<64xf32, #tpu.memory_space<smem>>
    %21 = vector.broadcast %20 : f32 to vector<16x16xf32>
    %22 = arith.mulf %7, %21 : vector<16x16xf32>
    %23 = arith.addf %19, %22 : vector<16x16xf32>
    %c1_15 = arith.constant 1 : index
    %24 = memref.load %arg2[%c1_15] : memref<64xf32, #tpu.memory_space<smem>>
    %25 = vector.broadcast %24 : f32 to vector<16x16xf32>
    %26 = arith.mulf %1, %25 : vector<16x16xf32>
    %c17 = arith.constant 17 : index
    %27 = memref.load %arg2[%c17] : memref<64xf32, #tpu.memory_space<smem>>
    %28 = vector.broadcast %27 : f32 to vector<16x16xf32>
    %29 = arith.mulf %3, %28 : vector<16x16xf32>
    %30 = arith.addf %26, %29 : vector<16x16xf32>
    %c33 = arith.constant 33 : index
    %31 = memref.load %arg2[%c33] : memref<64xf32, #tpu.memory_space<smem>>
    %32 = vector.broadcast %31 : f32 to vector<16x16xf32>
    %33 = arith.mulf %5, %32 : vector<16x16xf32>
    %34 = arith.addf %30, %33 : vector<16x16xf32>
    %c49 = arith.constant 49 : index
    %35 = memref.load %arg2[%c49] : memref<64xf32, #tpu.memory_space<smem>>
    %36 = vector.broadcast %35 : f32 to vector<16x16xf32>
    %37 = arith.mulf %7, %36 : vector<16x16xf32>
    %38 = arith.addf %34, %37 : vector<16x16xf32>
    %39 = tpu.concatenate %23, %38 in 1 : vector<16x16xf32>, vector<16x16xf32> -> vector<16x32xf32>
    %cst = arith.constant dense<0.000000e+00> : vector<16x32xf32>
    %40 = tpu.matmul %39, %8, %cst {dimension_numbers = #tpu.dot_dimension_numbers<[1], [0], [0], [1], [0, 0, 1, 1], [], []>} : vector<16x32xf32>, vector<32x32xf32>, vector<16x32xf32> -> vector<16x32xf32>
    %c2_16 = arith.constant 2 : index
    %41 = memref.load %arg2[%c2_16] : memref<64xf32, #tpu.memory_space<smem>>
    %42 = vector.broadcast %41 : f32 to vector<16x16xf32>
    %43 = arith.mulf %1, %42 : vector<16x16xf32>
    %c18 = arith.constant 18 : index
    %44 = memref.load %arg2[%c18] : memref<64xf32, #tpu.memory_space<smem>>
    %45 = vector.broadcast %44 : f32 to vector<16x16xf32>
    %46 = arith.mulf %3, %45 : vector<16x16xf32>
    %47 = arith.addf %43, %46 : vector<16x16xf32>
    %c34 = arith.constant 34 : index
    %48 = memref.load %arg2[%c34] : memref<64xf32, #tpu.memory_space<smem>>
    %49 = vector.broadcast %48 : f32 to vector<16x16xf32>
    %50 = arith.mulf %5, %49 : vector<16x16xf32>
    %51 = arith.addf %47, %50 : vector<16x16xf32>
    %c50 = arith.constant 50 : index
    %52 = memref.load %arg2[%c50] : memref<64xf32, #tpu.memory_space<smem>>
    %53 = vector.broadcast %52 : f32 to vector<16x16xf32>
    %54 = arith.mulf %7, %53 : vector<16x16xf32>
    %55 = arith.addf %51, %54 : vector<16x16xf32>
    %c3_17 = arith.constant 3 : index
    %56 = memref.load %arg2[%c3_17] : memref<64xf32, #tpu.memory_space<smem>>
    %57 = vector.broadcast %56 : f32 to vector<16x16xf32>
    %58 = arith.mulf %1, %57 : vector<16x16xf32>
    %c19 = arith.constant 19 : index
    %59 = memref.load %arg2[%c19] : memref<64xf32, #tpu.memory_space<smem>>
    %60 = vector.broadcast %59 : f32 to vector<16x16xf32>
    %61 = arith.mulf %3, %60 : vector<16x16xf32>
    %62 = arith.addf %58, %61 : vector<16x16xf32>
    %c35 = arith.constant 35 : index
    %63 = memref.load %arg2[%c35] : memref<64xf32, #tpu.memory_space<smem>>
    %64 = vector.broadcast %63 : f32 to vector<16x16xf32>
    %65 = arith.mulf %5, %64 : vector<16x16xf32>
    %66 = arith.addf %62, %65 : vector<16x16xf32>
    %c51 = arith.constant 51 : index
    %67 = memref.load %arg2[%c51] : memref<64xf32, #tpu.memory_space<smem>>
    %68 = vector.broadcast %67 : f32 to vector<16x16xf32>
    %69 = arith.mulf %7, %68 : vector<16x16xf32>
    %70 = arith.addf %66, %69 : vector<16x16xf32>
    %71 = tpu.concatenate %55, %70 in 1 : vector<16x16xf32>, vector<16x16xf32> -> vector<16x32xf32>
    %cst_18 = arith.constant dense<0.000000e+00> : vector<16x32xf32>
    %72 = tpu.matmul %71, %8, %cst_18 {dimension_numbers = #tpu.dot_dimension_numbers<[1], [0], [0], [1], [0, 0, 1, 1], [], []>} : vector<16x32xf32>, vector<32x32xf32>, vector<16x32xf32> -> vector<16x32xf32>
    %73 = tpu.concatenate %40, %72 in 1 : vector<16x32xf32>, vector<16x32xf32> -> vector<16x64xf32>
    %c0_19 = arith.constant 0 : index
    %74 = memref.load %arg3[%c0_19] : memref<4xf32, #tpu.memory_space<smem>>
    %75 = vector.broadcast %74 : f32 to vector<16x64xf32>
    %76 = arith.addf %73, %75 : vector<16x64xf32>
    %c0_20 = arith.constant 0 : index
    %c0_21 = arith.constant 0 : index
    %c0_22 = arith.constant 0 : index
    %c0_23 = arith.constant 0 : index
    %77 = vector.load %arg6[%c0_20, %c0_21, %c0_22, %c0_23] : memref<1x4x16x64xf32, #tpu.memory_space<vmem>>, vector<1x1x16x64xf32>
    %78 = vector.shape_cast %77 : vector<1x1x16x64xf32> to vector<16x64xf32>
    %79 = vector.shape_cast %76 : vector<16x64xf32> to vector<1x1x16x64xf32>
    tpu.vector_store %arg6[%c0_20, %c0_21, %c0_22, %c0_23], %79 {strides = array<i32>} : memref<1x4x16x64xf32, #tpu.memory_space<vmem>>, vector<1x1x16x64xf32>,
    %c4 = arith.constant 4 : index
    %80 = memref.load %arg2[%c4] : memref<64xf32, #tpu.memory_space<smem>>
    %81 = vector.broadcast %80 : f32 to vector<16x16xf32>
    %82 = arith.mulf %1, %81 : vector<16x16xf32>
    %c20 = arith.constant 20 : index
    %83 = memref.load %arg2[%c20] : memref<64xf32, #tpu.memory_space<smem>>
    %84 = vector.broadcast %83 : f32 to vector<16x16xf32>
    %85 = arith.mulf %3, %84 : vector<16x16xf32>
    %86 = arith.addf %82, %85 : vector<16x16xf32>
    %c36 = arith.constant 36 : index
    %87 = memref.load %arg2[%c36] : memref<64xf32, #tpu.memory_space<smem>>
    %88 = vector.broadcast %87 : f32 to vector<16x16xf32>
    %89 = arith.mulf %5, %88 : vector<16x16xf32>
    %90 = arith.addf %86, %89 : vector<16x16xf32>
    %c52 = arith.constant 52 : index
    %91 = memref.load %arg2[%c52] : memref<64xf32, #tpu.memory_space<smem>>
    %92 = vector.broadcast %91 : f32 to vector<16x16xf32>
    %93 = arith.mulf %7, %92 : vector<16x16xf32>
    %94 = arith.addf %90, %93 : vector<16x16xf32>
    %c5 = arith.constant 5 : index
    %95 = memref.load %arg2[%c5] : memref<64xf32, #tpu.memory_space<smem>>
    %96 = vector.broadcast %95 : f32 to vector<16x16xf32>
    %97 = arith.mulf %1, %96 : vector<16x16xf32>
    %c21 = arith.constant 21 : index
    %98 = memref.load %arg2[%c21] : memref<64xf32, #tpu.memory_space<smem>>
    %99 = vector.broadcast %98 : f32 to vector<16x16xf32>
    %100 = arith.mulf %3, %99 : vector<16x16xf32>
    %101 = arith.addf %97, %100 : vector<16x16xf32>
    %c37 = arith.constant 37 : index
    %102 = memref.load %arg2[%c37] : memref<64xf32, #tpu.memory_space<smem>>
    %103 = vector.broadcast %102 : f32 to vector<16x16xf32>
    %104 = arith.mulf %5, %103 : vector<16x16xf32>
    %105 = arith.addf %101, %104 : vector<16x16xf32>
    %c53 = arith.constant 53 : index
    %106 = memref.load %arg2[%c53] : memref<64xf32, #tpu.memory_space<smem>>
    %107 = vector.broadcast %106 : f32 to vector<16x16xf32>
    %108 = arith.mulf %7, %107 : vector<16x16xf32>
    %109 = arith.addf %105, %108 : vector<16x16xf32>
    %110 = tpu.concatenate %94, %109 in 1 : vector<16x16xf32>, vector<16x16xf32> -> vector<16x32xf32>
    %cst_24 = arith.constant dense<0.000000e+00> : vector<16x32xf32>
    %111 = tpu.matmul %110, %8, %cst_24 {dimension_numbers = #tpu.dot_dimension_numbers<[1], [0], [0], [1], [0, 0, 1, 1], [], []>} : vector<16x32xf32>, vector<32x32xf32>, vector<16x32xf32> -> vector<16x32xf32>
    %c6 = arith.constant 6 : index
    %112 = memref.load %arg2[%c6] : memref<64xf32, #tpu.memory_space<smem>>
    %113 = vector.broadcast %112 : f32 to vector<16x16xf32>
    %114 = arith.mulf %1, %113 : vector<16x16xf32>
    %c22 = arith.constant 22 : index
    %115 = memref.load %arg2[%c22] : memref<64xf32, #tpu.memory_space<smem>>
    %116 = vector.broadcast %115 : f32 to vector<16x16xf32>
    %117 = arith.mulf %3, %116 : vector<16x16xf32>
    %118 = arith.addf %114, %117 : vector<16x16xf32>
    %c38 = arith.constant 38 : index
    %119 = memref.load %arg2[%c38] : memref<64xf32, #tpu.memory_space<smem>>
    %120 = vector.broadcast %119 : f32 to vector<16x16xf32>
    %121 = arith.mulf %5, %120 : vector<16x16xf32>
    %122 = arith.addf %118, %121 : vector<16x16xf32>
    %c54 = arith.constant 54 : index
    %123 = memref.load %arg2[%c54] : memref<64xf32, #tpu.memory_space<smem>>
    %124 = vector.broadcast %123 : f32 to vector<16x16xf32>
    %125 = arith.mulf %7, %124 : vector<16x16xf32>
    %126 = arith.addf %122, %125 : vector<16x16xf32>
    %c7 = arith.constant 7 : index
    %127 = memref.load %arg2[%c7] : memref<64xf32, #tpu.memory_space<smem>>
    %128 = vector.broadcast %127 : f32 to vector<16x16xf32>
    %129 = arith.mulf %1, %128 : vector<16x16xf32>
    %c23 = arith.constant 23 : index
    %130 = memref.load %arg2[%c23] : memref<64xf32, #tpu.memory_space<smem>>
    %131 = vector.broadcast %130 : f32 to vector<16x16xf32>
    %132 = arith.mulf %3, %131 : vector<16x16xf32>
    %133 = arith.addf %129, %132 : vector<16x16xf32>
    %c39 = arith.constant 39 : index
    %134 = memref.load %arg2[%c39] : memref<64xf32, #tpu.memory_space<smem>>
    %135 = vector.broadcast %134 : f32 to vector<16x16xf32>
    %136 = arith.mulf %5, %135 : vector<16x16xf32>
    %137 = arith.addf %133, %136 : vector<16x16xf32>
    %c55 = arith.constant 55 : index
    %138 = memref.load %arg2[%c55] : memref<64xf32, #tpu.memory_space<smem>>
    %139 = vector.broadcast %138 : f32 to vector<16x16xf32>
    %140 = arith.mulf %7, %139 : vector<16x16xf32>
    %141 = arith.addf %137, %140 : vector<16x16xf32>
    %142 = tpu.concatenate %126, %141 in 1 : vector<16x16xf32>, vector<16x16xf32> -> vector<16x32xf32>
    %cst_25 = arith.constant dense<0.000000e+00> : vector<16x32xf32>
    %143 = tpu.matmul %142, %8, %cst_25 {dimension_numbers = #tpu.dot_dimension_numbers<[1], [0], [0], [1], [0, 0, 1, 1], [], []>} : vector<16x32xf32>, vector<32x32xf32>, vector<16x32xf32> -> vector<16x32xf32>
    %144 = tpu.concatenate %111, %143 in 1 : vector<16x32xf32>, vector<16x32xf32> -> vector<16x64xf32>
    %c1_26 = arith.constant 1 : index
    %145 = memref.load %arg3[%c1_26] : memref<4xf32, #tpu.memory_space<smem>>
    %146 = vector.broadcast %145 : f32 to vector<16x64xf32>
    %147 = arith.addf %144, %146 : vector<16x64xf32>
    %c0_27 = arith.constant 0 : index
    %c1_28 = arith.constant 1 : index
    %c0_29 = arith.constant 0 : index
    %c0_30 = arith.constant 0 : index
    %148 = vector.load %arg6[%c0_27, %c1_28, %c0_29, %c0_30] : memref<1x4x16x64xf32, #tpu.memory_space<vmem>>, vector<1x1x16x64xf32>
    %149 = vector.shape_cast %148 : vector<1x1x16x64xf32> to vector<16x64xf32>
    %150 = vector.shape_cast %147 : vector<16x64xf32> to vector<1x1x16x64xf32>
    tpu.vector_store %arg6[%c0_27, %c1_28, %c0_29, %c0_30], %150 {strides = array<i32>} : memref<1x4x16x64xf32, #tpu.memory_space<vmem>>, vector<1x1x16x64xf32>,
    %c8 = arith.constant 8 : index
    %151 = memref.load %arg2[%c8] : memref<64xf32, #tpu.memory_space<smem>>
    %152 = vector.broadcast %151 : f32 to vector<16x16xf32>
    %153 = arith.mulf %1, %152 : vector<16x16xf32>
    %c24 = arith.constant 24 : index
    %154 = memref.load %arg2[%c24] : memref<64xf32, #tpu.memory_space<smem>>
    %155 = vector.broadcast %154 : f32 to vector<16x16xf32>
    %156 = arith.mulf %3, %155 : vector<16x16xf32>
    %157 = arith.addf %153, %156 : vector<16x16xf32>
    %c40 = arith.constant 40 : index
    %158 = memref.load %arg2[%c40] : memref<64xf32, #tpu.memory_space<smem>>
    %159 = vector.broadcast %158 : f32 to vector<16x16xf32>
    %160 = arith.mulf %5, %159 : vector<16x16xf32>
    %161 = arith.addf %157, %160 : vector<16x16xf32>
    %c56 = arith.constant 56 : index
    %162 = memref.load %arg2[%c56] : memref<64xf32, #tpu.memory_space<smem>>
    %163 = vector.broadcast %162 : f32 to vector<16x16xf32>
    %164 = arith.mulf %7, %163 : vector<16x16xf32>
    %165 = arith.addf %161, %164 : vector<16x16xf32>
    %c9 = arith.constant 9 : index
    %166 = memref.load %arg2[%c9] : memref<64xf32, #tpu.memory_space<smem>>
    %167 = vector.broadcast %166 : f32 to vector<16x16xf32>
    %168 = arith.mulf %1, %167 : vector<16x16xf32>
    %c25 = arith.constant 25 : index
    %169 = memref.load %arg2[%c25] : memref<64xf32, #tpu.memory_space<smem>>
    %170 = vector.broadcast %169 : f32 to vector<16x16xf32>
    %171 = arith.mulf %3, %170 : vector<16x16xf32>
    %172 = arith.addf %168, %171 : vector<16x16xf32>
    %c41 = arith.constant 41 : index
    %173 = memref.load %arg2[%c41] : memref<64xf32, #tpu.memory_space<smem>>
    %174 = vector.broadcast %173 : f32 to vector<16x16xf32>
    %175 = arith.mulf %5, %174 : vector<16x16xf32>
    %176 = arith.addf %172, %175 : vector<16x16xf32>
    %c57 = arith.constant 57 : index
    %177 = memref.load %arg2[%c57] : memref<64xf32, #tpu.memory_space<smem>>
    %178 = vector.broadcast %177 : f32 to vector<16x16xf32>
    %179 = arith.mulf %7, %178 : vector<16x16xf32>
    %180 = arith.addf %176, %179 : vector<16x16xf32>
    %181 = tpu.concatenate %165, %180 in 1 : vector<16x16xf32>, vector<16x16xf32> -> vector<16x32xf32>
    %cst_31 = arith.constant dense<0.000000e+00> : vector<16x32xf32>
    %182 = tpu.matmul %181, %8, %cst_31 {dimension_numbers = #tpu.dot_dimension_numbers<[1], [0], [0], [1], [0, 0, 1, 1], [], []>} : vector<16x32xf32>, vector<32x32xf32>, vector<16x32xf32> -> vector<16x32xf32>
    %c10 = arith.constant 10 : index
    %183 = memref.load %arg2[%c10] : memref<64xf32, #tpu.memory_space<smem>>
    %184 = vector.broadcast %183 : f32 to vector<16x16xf32>
    %185 = arith.mulf %1, %184 : vector<16x16xf32>
    %c26 = arith.constant 26 : index
    %186 = memref.load %arg2[%c26] : memref<64xf32, #tpu.memory_space<smem>>
    %187 = vector.broadcast %186 : f32 to vector<16x16xf32>
    %188 = arith.mulf %3, %187 : vector<16x16xf32>
    %189 = arith.addf %185, %188 : vector<16x16xf32>
    %c42 = arith.constant 42 : index
    %190 = memref.load %arg2[%c42] : memref<64xf32, #tpu.memory_space<smem>>
    %191 = vector.broadcast %190 : f32 to vector<16x16xf32>
    %192 = arith.mulf %5, %191 : vector<16x16xf32>
    %193 = arith.addf %189, %192 : vector<16x16xf32>
    %c58 = arith.constant 58 : index
    %194 = memref.load %arg2[%c58] : memref<64xf32, #tpu.memory_space<smem>>
    %195 = vector.broadcast %194 : f32 to vector<16x16xf32>
    %196 = arith.mulf %7, %195 : vector<16x16xf32>
    %197 = arith.addf %193, %196 : vector<16x16xf32>
    %c11 = arith.constant 11 : index
    %198 = memref.load %arg2[%c11] : memref<64xf32, #tpu.memory_space<smem>>
    %199 = vector.broadcast %198 : f32 to vector<16x16xf32>
    %200 = arith.mulf %1, %199 : vector<16x16xf32>
    %c27 = arith.constant 27 : index
    %201 = memref.load %arg2[%c27] : memref<64xf32, #tpu.memory_space<smem>>
    %202 = vector.broadcast %201 : f32 to vector<16x16xf32>
    %203 = arith.mulf %3, %202 : vector<16x16xf32>
    %204 = arith.addf %200, %203 : vector<16x16xf32>
    %c43 = arith.constant 43 : index
    %205 = memref.load %arg2[%c43] : memref<64xf32, #tpu.memory_space<smem>>
    %206 = vector.broadcast %205 : f32 to vector<16x16xf32>
    %207 = arith.mulf %5, %206 : vector<16x16xf32>
    %208 = arith.addf %204, %207 : vector<16x16xf32>
    %c59 = arith.constant 59 : index
    %209 = memref.load %arg2[%c59] : memref<64xf32, #tpu.memory_space<smem>>
    %210 = vector.broadcast %209 : f32 to vector<16x16xf32>
    %211 = arith.mulf %7, %210 : vector<16x16xf32>
    %212 = arith.addf %208, %211 : vector<16x16xf32>
    %213 = tpu.concatenate %197, %212 in 1 : vector<16x16xf32>, vector<16x16xf32> -> vector<16x32xf32>
    %cst_32 = arith.constant dense<0.000000e+00> : vector<16x32xf32>
    %214 = tpu.matmul %213, %8, %cst_32 {dimension_numbers = #tpu.dot_dimension_numbers<[1], [0], [0], [1], [0, 0, 1, 1], [], []>} : vector<16x32xf32>, vector<32x32xf32>, vector<16x32xf32> -> vector<16x32xf32>
    %215 = tpu.concatenate %182, %214 in 1 : vector<16x32xf32>, vector<16x32xf32> -> vector<16x64xf32>
    %c2_33 = arith.constant 2 : index
    %216 = memref.load %arg3[%c2_33] : memref<4xf32, #tpu.memory_space<smem>>
    %217 = vector.broadcast %216 : f32 to vector<16x64xf32>
    %218 = arith.addf %215, %217 : vector<16x64xf32>
    %c0_34 = arith.constant 0 : index
    %c2_35 = arith.constant 2 : index
    %c0_36 = arith.constant 0 : index
    %c0_37 = arith.constant 0 : index
    %219 = vector.load %arg6[%c0_34, %c2_35, %c0_36, %c0_37] : memref<1x4x16x64xf32, #tpu.memory_space<vmem>>, vector<1x1x16x64xf32>
    %220 = vector.shape_cast %219 : vector<1x1x16x64xf32> to vector<16x64xf32>
    %221 = vector.shape_cast %218 : vector<16x64xf32> to vector<1x1x16x64xf32>
    tpu.vector_store %arg6[%c0_34, %c2_35, %c0_36, %c0_37], %221 {strides = array<i32>} : memref<1x4x16x64xf32, #tpu.memory_space<vmem>>, vector<1x1x16x64xf32>,
    %c12 = arith.constant 12 : index
    %222 = memref.load %arg2[%c12] : memref<64xf32, #tpu.memory_space<smem>>
    %223 = vector.broadcast %222 : f32 to vector<16x16xf32>
    %224 = arith.mulf %1, %223 : vector<16x16xf32>
    %c28 = arith.constant 28 : index
    %225 = memref.load %arg2[%c28] : memref<64xf32, #tpu.memory_space<smem>>
    %226 = vector.broadcast %225 : f32 to vector<16x16xf32>
    %227 = arith.mulf %3, %226 : vector<16x16xf32>
    %228 = arith.addf %224, %227 : vector<16x16xf32>
    %c44 = arith.constant 44 : index
    %229 = memref.load %arg2[%c44] : memref<64xf32, #tpu.memory_space<smem>>
    %230 = vector.broadcast %229 : f32 to vector<16x16xf32>
    %231 = arith.mulf %5, %230 : vector<16x16xf32>
    %232 = arith.addf %228, %231 : vector<16x16xf32>
    %c60 = arith.constant 60 : index
    %233 = memref.load %arg2[%c60] : memref<64xf32, #tpu.memory_space<smem>>
    %234 = vector.broadcast %233 : f32 to vector<16x16xf32>
    %235 = arith.mulf %7, %234 : vector<16x16xf32>
    %236 = arith.addf %232, %235 : vector<16x16xf32>
    %c13 = arith.constant 13 : index
    %237 = memref.load %arg2[%c13] : memref<64xf32, #tpu.memory_space<smem>>
    %238 = vector.broadcast %237 : f32 to vector<16x16xf32>
    %239 = arith.mulf %1, %238 : vector<16x16xf32>
    %c29 = arith.constant 29 : index
    %240 = memref.load %arg2[%c29] : memref<64xf32, #tpu.memory_space<smem>>
    %241 = vector.broadcast %240 : f32 to vector<16x16xf32>
    %242 = arith.mulf %3, %241 : vector<16x16xf32>
    %243 = arith.addf %239, %242 : vector<16x16xf32>
    %c45 = arith.constant 45 : index
    %244 = memref.load %arg2[%c45] : memref<64xf32, #tpu.memory_space<smem>>
    %245 = vector.broadcast %244 : f32 to vector<16x16xf32>
    %246 = arith.mulf %5, %245 : vector<16x16xf32>
    %247 = arith.addf %243, %246 : vector<16x16xf32>
    %c61 = arith.constant 61 : index
    %248 = memref.load %arg2[%c61] : memref<64xf32, #tpu.memory_space<smem>>
    %249 = vector.broadcast %248 : f32 to vector<16x16xf32>
    %250 = arith.mulf %7, %249 : vector<16x16xf32>
    %251 = arith.addf %247, %250 : vector<16x16xf32>
    %252 = tpu.concatenate %236, %251 in 1 : vector<16x16xf32>, vector<16x16xf32> -> vector<16x32xf32>
    %cst_38 = arith.constant dense<0.000000e+00> : vector<16x32xf32>
    %253 = tpu.matmul %252, %8, %cst_38 {dimension_numbers = #tpu.dot_dimension_numbers<[1], [0], [0], [1], [0, 0, 1, 1], [], []>} : vector<16x32xf32>, vector<32x32xf32>, vector<16x32xf32> -> vector<16x32xf32>
    %c14 = arith.constant 14 : index
    %254 = memref.load %arg2[%c14] : memref<64xf32, #tpu.memory_space<smem>>
    %255 = vector.broadcast %254 : f32 to vector<16x16xf32>
    %256 = arith.mulf %1, %255 : vector<16x16xf32>
    %c30 = arith.constant 30 : index
    %257 = memref.load %arg2[%c30] : memref<64xf32, #tpu.memory_space<smem>>
    %258 = vector.broadcast %257 : f32 to vector<16x16xf32>
    %259 = arith.mulf %3, %258 : vector<16x16xf32>
    %260 = arith.addf %256, %259 : vector<16x16xf32>
    %c46 = arith.constant 46 : index
    %261 = memref.load %arg2[%c46] : memref<64xf32, #tpu.memory_space<smem>>
    %262 = vector.broadcast %261 : f32 to vector<16x16xf32>
    %263 = arith.mulf %5, %262 : vector<16x16xf32>
    %264 = arith.addf %260, %263 : vector<16x16xf32>
    %c62 = arith.constant 62 : index
    %265 = memref.load %arg2[%c62] : memref<64xf32, #tpu.memory_space<smem>>
    %266 = vector.broadcast %265 : f32 to vector<16x16xf32>
    %267 = arith.mulf %7, %266 : vector<16x16xf32>
    %268 = arith.addf %264, %267 : vector<16x16xf32>
    %c15 = arith.constant 15 : index
    %269 = memref.load %arg2[%c15] : memref<64xf32, #tpu.memory_space<smem>>
    %270 = vector.broadcast %269 : f32 to vector<16x16xf32>
    %271 = arith.mulf %1, %270 : vector<16x16xf32>
    %c31 = arith.constant 31 : index
    %272 = memref.load %arg2[%c31] : memref<64xf32, #tpu.memory_space<smem>>
    %273 = vector.broadcast %272 : f32 to vector<16x16xf32>
    %274 = arith.mulf %3, %273 : vector<16x16xf32>
    %275 = arith.addf %271, %274 : vector<16x16xf32>
    %c47 = arith.constant 47 : index
    %276 = memref.load %arg2[%c47] : memref<64xf32, #tpu.memory_space<smem>>
    %277 = vector.broadcast %276 : f32 to vector<16x16xf32>
    %278 = arith.mulf %5, %277 : vector<16x16xf32>
    %279 = arith.addf %275, %278 : vector<16x16xf32>
    %c63 = arith.constant 63 : index
    %280 = memref.load %arg2[%c63] : memref<64xf32, #tpu.memory_space<smem>>
    %281 = vector.broadcast %280 : f32 to vector<16x16xf32>
    %282 = arith.mulf %7, %281 : vector<16x16xf32>
    %283 = arith.addf %279, %282 : vector<16x16xf32>
    %284 = tpu.concatenate %268, %283 in 1 : vector<16x16xf32>, vector<16x16xf32> -> vector<16x32xf32>
    %cst_39 = arith.constant dense<0.000000e+00> : vector<16x32xf32>
    %285 = tpu.matmul %284, %8, %cst_39 {dimension_numbers = #tpu.dot_dimension_numbers<[1], [0], [0], [1], [0, 0, 1, 1], [], []>} : vector<16x32xf32>, vector<32x32xf32>, vector<16x32xf32> -> vector<16x32xf32>
    %286 = tpu.concatenate %253, %285 in 1 : vector<16x32xf32>, vector<16x32xf32> -> vector<16x64xf32>
    %c3_40 = arith.constant 3 : index
    %287 = memref.load %arg3[%c3_40] : memref<4xf32, #tpu.memory_space<smem>>
    %288 = vector.broadcast %287 : f32 to vector<16x64xf32>
    %289 = arith.addf %286, %288 : vector<16x64xf32>
    %c0_41 = arith.constant 0 : index
    %c3_42 = arith.constant 3 : index
    %c0_43 = arith.constant 0 : index
    %c0_44 = arith.constant 0 : index
    %290 = vector.load %arg6[%c0_41, %c3_42, %c0_43, %c0_44] : memref<1x4x16x64xf32, #tpu.memory_space<vmem>>, vector<1x1x16x64xf32>
    %291 = vector.shape_cast %290 : vector<1x1x16x64xf32> to vector<16x64xf32>
    %292 = vector.shape_cast %289 : vector<16x64xf32> to vector<1x1x16x64xf32>
    tpu.vector_store %arg6[%c0_41, %c3_42, %c0_43, %c0_44], %292 {strides = array<i32>} : memref<1x4x16x64xf32, #tpu.memory_space<vmem>>, vector<1x1x16x64xf32>,
    return
  }
  func.func @transform_0(%arg0: i32, %arg1: i32, %arg2: memref<64xf32, #tpu.memory_space<smem>>, %arg3: memref<4xf32, #tpu.memory_space<smem>>) -> (i32, i32, i32, i32) {
    %c0_i32 = arith.constant 0 : i32
    %c0_i32_0 = arith.constant 0 : i32
    %c0_i32_1 = arith.constant 0 : i32
    return %arg0, %c0_i32, %arg1, %c0_i32_0 : i32, i32, i32, i32
  }
  func.func @transform_1(%arg0: i32, %arg1: i32, %arg2: memref<64xf32, #tpu.memory_space<smem>>, %arg3: memref<4xf32, #tpu.memory_space<smem>>) -> (i32, i32) {
    %c0_i32 = arith.constant 0 : i32
    %c0_i32_0 = arith.constant 0 : i32
    %c0_i32_1 = arith.constant 0 : i32
    return %c0_i32, %c0_i32_0 : i32, i32
  }
  func.func @transform_2(%arg0: i32, %arg1: i32, %arg2: memref<64xf32, #tpu.memory_space<smem>>, %arg3: memref<4xf32, #tpu.memory_space<smem>>) -> (i32, i32, i32, i32) {
    %c0_i32 = arith.constant 0 : i32
    %c0_i32_0 = arith.constant 0 : i32
    %c0_i32_1 = arith.constant 0 : i32
    return %arg0, %c0_i32, %arg1, %c0_i32_0 : i32, i32, i32, i32
  }
}

</mosaic_0001>

<bundles_post_ra>
// kernel: upsample_forward.1
= control target key start
LH: loop header
LB: loop body
LE: loop exit
PB: predicated region body
PF: predicated region fallthrough
CT: control target
= control target key end

     0   :  { %s2514_s0 = inlined_call_operand.vmem [shape: f32[64], index: 0, kind: input, shape index: {}]   ;;  %s2515_s2 = inlined_call_operand.hbm [shape: f32[2,4,16,16], index: 2, kind: input, shape index: {}]   ;;  %s2516_s3 = inlined_call_operand.vmem [shape: f32[32,32], index: 3, kind: input, shape index: {}]   ;;  %s2517_s4 = inlined_call_operand.vmem [shape: f32[2,4,16,64], index: 4, kind: output, shape index: {}]   ;;  %s2518_s1 = inlined_call_operand.vmem [shape: f32[4], index: 1, kind: input, shape index: {}]  }
   0x1   :  { %s9_s17 = sshll.u32 %s2514_s0, 4  ;;  %s13_s20 = sshll.u32 %s2518_s1, 4  ;;  %s10_s17 = int_to_ptr.vmem [resolvable:$true] %s9_s17  ;;  %s14_s20 = int_to_ptr.vmem [resolvable:$true] %s13_s20 }
   0x2   :  { %s1834_s21 = scalar_lea.vmem %s10_s17, 16  ;;  %p1839_p1 = scmp.lt.s32.totalorder %s10_s17, %s10_s17 }
   0x3   :  { %p1835_p0 = scmp.ne.s32.totalorder %s10_s17, %s1834_s21  ;;  %p1840_p2 = scmp.lt.s32.totalorder %s1834_s21, %s1834_s21 }
   0x5   :  { %p1841_p3 = por %p1840_p2, %p1839_p1 }
   0x7   :  { %p1842_p4 = pnand %p1841_p3, %p1835_p0 }
   0x9   :  { %1845 = shalt.err (!%p1842_p4)  }
   0xa   :  { %s1942_s22 = smov [#allocation3]   ;;  %s1846_s23 = scalar_lea.vmem %s14_s20, 16 }
   0xb   :  { %12 = dma.vmem_to_smem %s10_s17, 16, %s1942_s22, [#allocation2] }
   0xc   :  { %p1847_p5 = scmp.ne.s32.totalorder %s14_s20, %s1846_s23  ;;  %p1851_p6 = scmp.lt.s32.totalorder %s14_s20, %s14_s20 }
   0xd   :  { %p1852_p7 = scmp.lt.s32.totalorder %s1846_s23, %s1846_s23 }
   0xf   :  { %p1853_p8 = por %p1852_p7, %p1851_p6 }
  0x11   :  { %p1854_p9 = pnand %p1853_p8, %p1847_p5 }
  0x13   :  { %1857 = shalt.err (!%p1854_p9)  }
  0x14   :  { %s1943_s0 = smov [#allocation4]  }
  0x15   :  { %16 = dma.vmem_to_smem %s14_s20, 16, %s1943_s0, [#allocation2] }
  0x16   :  { %1912 = dma.done.wait [#allocation2], 32 }
  0x17   :  { %1913 = vsyncadd [#allocation2], 4294967264 }
  0x18   :  { %18 = sfence }
  0x19   :  { %19 = vsyncpa [#allocation6], 0 }
  0x1a   :  { %21 = vsyncpa [#allocation6 + $0x1], 0  ;;  %s1980_s1 = smov 0   ;;  %s1982_s24 = smov 0  }
  0x1b   :  { %s1984_s25 = smov 0   ;;  %s1986_s26 = smov 0  }
  0x1c   :  { %s1988_s27 = smov 0   ;;  %s1990_s28 = smov 0  }
  0x1d LB: > { %s1464_s29 = sadd.s32 4294967295, %s1940_s28   ;;  %s39_s30 = sadd.s32 1, %s1936_s27  ;;  %s1940_s28 = sphi %s1990_s28, %s27_s28   ;;  %s1936_s27 = sphi %s1988_s27, %s2526_s27   ;;  %s1932_s26 = sphi %s1986_s26, %s2525_s26   ;;  %s1928_s25 = sphi %s1984_s25, %s2524_s25   ;;  %s1924_s24 = sphi %s1982_s24, %s2523_s24   ;;  %s1920_s1 = sphi %s1980_s1, %s2522_s1  }
  0x1e   : > { %p41_p10 = scmp.ge.s32.totalorder %s39_s30, 2  ;;  %s48_s5 = sadd.s32 1, %s1928_s25 }
  0x1f   : > { %p55_p11 = scmp.ne.s32.totalorder %s1928_s25, %s1924_s24  ;;  %p56_p12 = scmp.eq.s32.totalorder %s1940_s28, 0 }
  0x20   : > { %s2528_s30 = smov (%p41_p10, %s39_s30), 0  ;;  %p61_p0 = scmp.ne.s32.totalorder %s1924_s24, %s1920_s1 }
  0x21   : > { %p2016_p13 = por %p56_p12, %p55_p11  ;;  %s43_s7 = ssub.s32 %s1936_s27, %s2528_s30 }
  0x22   : > { %p62_p1 = scmp.eq.s32.totalorder %s1464_s29, 0  ;;  %p46_p2 = scmp.eq.s32.totalorder %s43_s7, 0 }
  0x23   : > { %p1779_p4 = scmp.lt.s32.totalorder %s1940_s28, 2  ;;  %s137_s10 = sand.u32 1, %s1928_s25  }
  0x24   : > { %p2023_p3 = por %p62_p1, %p61_p0  ;;  %s1571_s11 = sshll.u32 %s1936_s27, 10 }
  0x25   : > { %s2029_s9 = scalar_select %p46_p2, %s1928_s25, %s48_s5  }
  0x26   : > { %s1468_s12 = sshll.u32 %s137_s10, 6  ;;  %s2036_s15 = scalar_lea.hbm %s2515_s2, %s1571_s11 }
  0x27   : > { %s141_s16 = scalar_lea.vmem [#allocation5], %s1468_s12  ;;  %p2040_p5 = pnand %p1779_p4, %p2016_p13 }
  0x28   : > { %s150_s17 = sshll.u32 %s141_s16, 4  ;;  %s2046_s19 = scalar_lea.sflag [#allocation6], %s137_s10  ;;  %s2044_s17 = int_to_ptr.vmem [resolvable:$true] %s150_s17 }
  0x29   : > { %s1858_s20 = scalar_lea.hbm %s2036_s15, 1024  ;;  %p1860_p7 = pneg %p2040_p5 }
  0x2a   : > { %p1859_p6 = scmp.ne.s32.totalorder %s2036_s15, %s1858_s20  ;;  %s1863_s23 = scalar_lea.hbm %s2515_s2, 2048 }
  0x2b   : > { %p1864_p10 = scmp.lt.u32.totalorder %s2036_s15, %s2515_s2  ;;  %p1865_p11 = scmp.lt.u32.totalorder %s1863_s23, %s1858_s20 }
  0x2c   : > { %p1861_p8 = pnand %p1860_p7, %p1859_p6  ;;  %p1867_p13 = scmp.lt.u32.totalorder %s1858_s20, %s2036_s15 }
  0x2d   : > { %p1866_p12 = por %p1865_p11, %p1864_p10 }
  0x2e   : > { %p1862_p9 = pneg %p1861_p8 }
  0x2f   : > { %p1868_p0 = por %p1867_p13, %p1866_p12 }
  0x31   : > { %p1869_p1 = pnand %p1868_p0, %p1862_p9 }
  0x33   : > { %1872 = shalt.err (!%p1869_p1)
}
  0x34   : > { %s1873_s29 = scalar_lea.vmem %s2044_s17, 1024  ;;  %s1944_s5 = smov [#allocation5]  }
  0x35   : > { %p1874_p2 = scmp.ne.s32.totalorder %s2044_s17, %s1873_s29  ;;  %s1878_s6 = sshll.u32 %s1944_s5, 4  ;;  %s1879_s6 = int_to_ptr.vmem [resolvable:$false] %s1878_s6 }
  0x36   : > { %s1880_s7 = scalar_lea.vmem %s1879_s6, 2048  ;;  %p1881_p8 = scmp.lt.s32.totalorder %s2044_s17, %s1879_s6 }
  0x37   : > { %p1876_p4 = pnand %p1874_p2, %p1860_p7  ;;  %p1882_p10 = scmp.lt.s32.totalorder %s1880_s7, %s1873_s29 }
  0x39   : > { %p1877_p6 = pneg %p1876_p4  ;;  %p1883_p11 = por %p1882_p10, %p1881_p8 }
  0x3b   : > { %p1884_p12 = pnand %p1883_p11, %p1877_p6 }
  0x3d   : > { %1887 = shalt.err (!%p1884_p12)
}
  0x3e   : > { %s1945_s10 = smov 128   ;;  %s1946_s11 = smov 8  }
  0x3f   : > { %1778 = dma.hbm_to_vmem [thread:$0]  (!%p2040_p5), %s2036_s15, 1024, %s2044_s17, %s2046_s19, %s1945_s10, %s1945_s10, %s1946_s11  }
  0x40   : > { %p1471_p7 = scmp.ge.s32.totalorder %s1940_s28, 1  ;;  %p158_p9 = scmp.lt.s32.totalorder %s1940_s28, 3 }
  0x42   : > { %p159_p13 = pnand %p1471_p7, %p158_p9 }
  0x43   : > { %s164_s12 = sand.u32 (!%p159_p13), 1, %s1924_s24  }
  0x44   : > { %162 = sbr.rel (%p159_p13) target bundleno = 568 (0x238), region = 28  ;;  %s1472_s13 = sshll.u32 (!%p159_p13), %s164_s12, 6 }
  0x45   : > { %s165_s14 = scalar_lea.sflag (!%p159_p13), [#allocation6], %s164_s12  ;;  %s168_s16 = scalar_lea.vmem (!%p159_p13), [#allocation5], %s1472_s13 }
  0x4b   : > { %1915 = dma.done.wait (%p2023_p3), %s165_s14, 1024  }
  0x4c   : > { %1917 = vsyncadd (%p2023_p3), %s165_s14, 4294966272  ;;  %s1494_s20 = sld [smem:[#allocation3 + $0x3]]  ;;  %s2081_s15 = sld [smem:[#allocation3 + $0x7]]  ;;  %v2091_v0 = vld [vmem:[%s168_s16] sm:$0xff]  ;;  %v2093_v1 = vld [vmem:[%s168_s16 + $0x8] sm:$0xff]  ;;  %vm271_vm0 = vcmask 130048  }
  0x4d   : > { %s1495_s21 = sld [smem:[#allocation3 + $0x13]]  ;;  %s2083_s17 = sld [smem:[#allocation3 + $0x17]]  ;;  %v2095_v2 = vld [vmem:[%s168_s16 + $0x10] sm:$0xff]  ;;  %v2099_v4 = vld [vmem:[%s168_s16 + $0x18] sm:$0xff]  ;;  %v2101_v5 = vld [vmem:[%s168_s16 + $0x20] sm:$0xff]  ;;  %vm274_vm1 = vcmask 261120  }
  0x4e   : > { %s1496_s22 = sld [smem:[#allocation3 + $0x23]]  ;;  %s2085_s19 = sld [smem:[#allocation3 + $0x27]]  ;;  %v2103_v6 = vld [vmem:[%s168_s16 + $0x28] sm:$0xff]  ;;  %v2109_v10 = vld [vmem:[%s168_s16 + $0x30] sm:$0xff]  ;;  %v2111_v11 = vld [vmem:[%s168_s16 + $0x38] sm:$0xff]  ;;  %vm505_vm2 = vcmask 523264  }
  0x4f   : > { %s1497_s18 = sld [smem:[#allocation3 + $0x33]]  ;;  %s2087_s23 = sld [smem:[#allocation3 + $0x37]] }
  0x50   : > { %s2089_s0 = sld [smem:[#allocation3 + $0xb]]  ;;  %s2127_s5 = sld [smem:[#allocation3 + $0xf]] }
  0x51   : > { %s2097_s8 = sld [smem:[#allocation3 + $0x1b]]  ;;  %s2129_s6 = sld [smem:[#allocation3 + $0x1f]] }
  0x52   : > { %v379_v3 = vstv %s1494_s20  ;;  %s2107_s1 = sld [smem:[#allocation3 + $0x2b]]  ;;  %v666_v22 = vstv %s2081_s15  ;;  %s2133_s7 = sld [smem:[#allocation3 + $0x2f]] }
  0x53   : > { %v380_v7 = vmul.f32 %v379_v3, %v2091_v0  ;;  %v381_v8 = vmul.f32 %v379_v3, %v2093_v1  ;;  %v383_v9 = vstv %s1495_s21  ;;  %s2119_s29 = sld [smem:[#allocation3 + $0x3b]]  ;;  %v670_v23 = vstv %s2083_s17  ;;  %s2138_s10 = sld [smem:[#allocation3 + $0x3f]]  ;;  %v215_v3 = vld [vmem:[%s2516_s3] sm:$0xff] }
  0x54   : > { %v384_v12 = vmul.f32 %v2095_v2, %v383_v9  ;;  %v385_v13 = vmul.f32 %v2099_v4, %v383_v9  ;;  %v389_v14 = vstv %s1496_s22  ;;  %v667_v24 = vmul.f32 %v666_v22, %v2091_v0  ;;  %s1947_s11 = smov 16   ;;  %s2153_s12 = sld [smem:[#allocation3 + $0x1]] }
  0x55   : > { %v395_v15 = vstv %s1497_s18  ;;  %v390_v16 = vmul.f32 %v2101_v5, %v389_v14  ;;  %v391_v17 = vmul.f32 %v2103_v6, %v389_v14  ;;  %v668_v25 = vmul.f32 %v666_v22, %v2093_v1  ;;  %s2159_s13 = sld [smem:[#allocation3 + $0x11]]  ;;  %v217_v14 = vld [vmem:[%s2516_s3 + $0x10] sm:$0xff]  ;;  %s1553_s16 = sld [smem:[#allocation3 + $0x3d]] }
  0x56   : > { %v396_v18 = vmul.f32 %v2109_v10, %v395_v15  ;;  %v397_v19 = vmul.f32 %v2111_v11, %v395_v15  ;;  %v386_v20 = vadd.f32 %v384_v12, %v380_v7  ;;  %v387_v21 = vadd.f32 %v385_v13, %v381_v8  ;;  %s2161_s14 = sld [smem:[#allocation3 + $0x21]]  ;;  %v216_v7 = vld [vmem:[%s2516_s3 + $0x8] sm:$0xff]  ;;  %v218_v15 = vld [vmem:[%s2516_s3 + $0x18] sm:$0xff]  ;;  %s1490_s20 = sld [smem:[#allocation3 + $0x2]] }
  0x57   : > { %v671_v26 = vmul.f32 %v2095_v2, %v670_v23  ;;  %v672_v27 = vmul.f32 %v2099_v4, %v670_v23  ;;  %v676_v30 = vstv %s2085_s19  ;;  %v682_v31 = vstv %s2087_s23  ;;  %s2182_s23 = sld [smem:[#allocation3 + $0x31]]  ;;  %s1491_s21 = sld [smem:[#allocation3 + $0x12]] }
  0x58   : > { %v392_v28 = vadd.f32 %v390_v16, %v386_v20  ;;  %v393_v29 = vadd.f32 %v391_v17, %v387_v21  ;;  %v677_v33 = vmul.f32 %v2101_v5, %v676_v30  ;;  %v678_v34 = vmul.f32 %v2103_v6, %v676_v30  ;;  %s1492_s22 = sld [smem:[#allocation3 + $0x22]]  ;;  %s2260_s18 = sld [smem:[#allocation3 + $0x6]] }
  0x59   : > { %v673_v32 = vadd.f32 %v671_v26, %v667_v24  ;;  %v683_v35 = vmul.f32 %v2109_v10, %v682_v31  ;;  %v684_v38 = vmul.f32 %v2111_v11, %v682_v31  ;;  %v674_v39 = vadd.f32 %v672_v27, %v668_v25  ;;  %s2262_s15 = sld [smem:[#allocation3 + $0x16]]  ;;  %s2264_s17 = sld [smem:[#allocation3 + $0x32]] }
  0x5a   : > { %v398_v36 = vadd.f32 %v396_v18, %v392_v28  ;;  %v399_v37 = vadd.f32 %v397_v19, %v393_v29  ;;  %v953_v41 = vstv %s2089_s0  ;;  %v957_v42 = vstv %s2097_s8  ;;  %s1504_s0 = sld [smem:[#allocation3 + $0x5]]  ;;  %s2266_s19 = sld [smem:[#allocation3 + $0x26]] }
  0x5b   : > { %v679_v40 = vadd.f32 %v677_v33, %v673_v32  ;;  %v963_v43 = vstv %s2107_s1  ;;  %v680_v44 = vadd.f32 %v678_v34, %v674_v39  ;;  %v954_v45 = vmul.f32 %v953_v41, %v2091_v0  ;;  %s1505_s8 = sld [smem:[#allocation3 + $0x15]]  ;;  %p195_p3 = scmp.lt.s32.totalorder %s1932_s26, 1 }
  0x5c   : > { %402 = vrot.lane.b32.xlu0 %v398_v36, %s1947_s11  ;;  %v958_v46 = vmul.f32 %v2095_v2, %v957_v42  ;;  %v964_v47 = vmul.f32 %v2101_v5, %v963_v43  ;;  %v969_v49 = vstv %s2119_s29  ;;  %v955_v50 = vmul.f32 %v953_v41, %v2093_v1  ;;  %s1506_s1 = sld [smem:[#allocation3 + $0x25]] }
  0x5d   : > { %v685_v48 = vadd.f32 %v683_v35, %v679_v40  ;;  %v959_v51 = vmul.f32 %v2099_v4, %v957_v42  ;;  %v686_v52 = vadd.f32 %v684_v38, %v680_v44  ;;  %v970_v54 = vmul.f32 %v2109_v10, %v969_v49  ;;  %s1507_s29 = sld [smem:[#allocation3 + $0x35]]  ;;  %s2530_s26 = smov (!%p195_p3, %s1932_s26), 1 }
  0x5e   : > { %v960_v53 = vadd.f32 %v958_v46, %v954_v45  ;;  %v965_v55 = vmul.f32 %v2103_v6, %v963_v43  ;;  %v971_v57 = vmul.f32 %v2111_v11, %v969_v49  ;;  %v1240_v58 = vstv %s2127_s5  ;;  %s2223_s5 = sld [smem:[#allocation3 + $0x9]] }
  0x5f   : > { %689 = vrot.lane.b32.xlu1 %v685_v48, %s1947_s11  ;;  %v961_v56 = vadd.f32 %v959_v51, %v955_v50  ;;  %v1244_v59 = vstv %s2129_s6  ;;  %v1241_v61 = vmul.f32 %v1240_v58, %v2091_v0  ;;  %v1250_v63 = vstv %s2133_s7  ;;  %s1528_s6 = sld [smem:[#allocation3 + $0x19]] }
  0x60   : > { %404 = vrot.lane.b32.xlu0 %v399_v37, %s1947_s11  ;;  %v966_v60 = vadd.f32 %v964_v47, %v960_v53  ;;  %v1245_v62 = vmul.f32 %v2095_v2, %v1244_v59  ;;  %v1251_v9 = vmul.f32 %v2101_v5, %v1250_v63  ;;  %v1256_v12 = vstv %s2138_s10  ;;  %s1529_s7 = sld [smem:[#allocation3 + $0x29]] }
  0x61   : > { %v967_v8 = vadd.f32 %v965_v55, %v961_v56  ;;  %v1242_v13 = vmul.f32 %v1240_v58, %v2093_v1  ;;  %v1257_v18 = vmul.f32 %v2109_v10, %v1256_v12  ;;  %v1246_v19 = vmul.f32 %v2099_v4, %v1244_v59  ;;  %s1530_s10 = sld [smem:[#allocation3 + $0x39]] }
  0x62   : > { %v972_v16 = vadd.f32 %v970_v54, %v966_v60  ;;  %v1247_v17 = vadd.f32 %v1245_v62, %v1241_v61  ;;  %v1252_v21 = vmul.f32 %v2103_v6, %v1250_v63  ;;  %v2188_v22 = vpack.c.bf16 %v216_v7, %v215_v3 }
  0x63   : > { %691 = vrot.lane.b32.xlu1 %v686_v52, %s1947_s11  ;;  %v973_v20 = vadd.f32 %v971_v57, %v967_v8  ;;  %v1248_v24 = vadd.f32 %v1246_v19, %v1242_v13  ;;  %v1258_v25 = vmul.f32 %v2111_v11, %v1256_v12  ;;  %v2192_v26 = vpack.c.bf16 %v218_v15, %v217_v14 }
  0x64   : > { %976 = vrot.lane.b32.xlu0 %v972_v16, %s1947_s11  ;;  %v1253_v23 = vadd.f32 %v1251_v9, %v1247_v17  ;;  %1718 = vmatprep.subr.bf16.mxu1 %v2188_v22  ;;  %v242_v29 = vstv %s2153_s12  ;;  %v246_v30 = vstv %s2159_s13  ;;  %v252_v31 = vstv %s2161_s14  ;;  %s2231_s12 = sld [smem:[#allocation3 + $0xd]] }
  0x65   : > { %1710 = vmatprep.subr.bf16.mxu0 %v2188_v22  ;;  %v1254_v28 = vadd.f32 %v1252_v21, %v1248_v24  ;;  %1720 = vmatpush3.bf16.msra.mxu1 %v2188_v22  ;;  %v243_v33 = vmul.f32 %v242_v29, %v2091_v0  ;;  %v247_v34 = vmul.f32 %v2095_v2, %v246_v30  ;;  %v258_v36 = vstv %s2182_s23  ;;  %s2235_s13 = sld [smem:[#allocation3 + $0x1d]]  ;;  %s2274_s23 = sld [smem:[#allocation3 + $0xa]] }
  0x66   : > { %v1259_v27 = vadd.f32 %v1257_v18, %v1253_v23  ;;  %1722 = vmatprep.subr.bf16.mxu1 %v2192_v26  ;;  %v253_v35 = vmul.f32 %v2101_v5, %v252_v31  ;;  %v244_v37 = vmul.f32 %v242_v29, %v2093_v1  ;;  %v248_v38 = vmul.f32 %v2099_v4, %v246_v30  ;;  %s1552_s14 = sld [smem:[#allocation3 + $0x2d]] }
  0x67   : > { %978 = vrot.lane.b32.xlu1 %v973_v20, %s1947_s11  ;;  %v1260_v32 = vadd.f32 %v1258_v25, %v1254_v28  ;;  %1712 = vmatpush3.bf16.msra.mxu0 %v2188_v22  ;;  %v249_v39 = vadd.f32 %v247_v34, %v243_v33  ;;  %v259_v40 = vmul.f32 %v2109_v10, %v258_v36  ;;  %v531_v48 = vstv %s1504_s0  ;;  %s2276_s0 = sld [smem:[#allocation3 + $0x1a]] }
  0x68   : > { %1263 = vrot.lane.b32.xlu0 %v1259_v27, %s1947_s11  ;;  %v254_v41 = vmul.f32 %v2103_v6, %v252_v31  ;;  %v250_v42 = vadd.f32 %v248_v38, %v244_v37  ;;  %v260_v43 = vmul.f32 %v2111_v11, %v258_v36  ;;  %1714 = vmatprep.subr.bf16.mxu0 %v2192_v26  ;;  %v535_v49 = vstv %s1505_s8  ;;  %s2285_s8 = sld [smem:[#allocation3 + $0x2a]] }
  0x69   : > { %1724 = vmatpush3.bf16.msra.mxu1 %v2192_v26  ;;  %v255_v44 = vadd.f32 %v253_v35, %v249_v39  ;;  %v532_v50 = vmul.f32 %v531_v48, %v2091_v0  ;;  %v536_v51 = vmul.f32 %v2095_v2, %v535_v49  ;;  %v541_v52 = vstv %s1506_s1  ;;  %s2290_s1 = sld [smem:[#allocation3 + $0x3a]] }
  0x6a   : > { %1734 = vmatprep.subr.bf16.mxu1 %v2188_v22  ;;  %v256_v45 = vadd.f32 %v254_v41, %v250_v42  ;;  %v547_v53 = vstv %s1507_s29  ;;  %v533_v54 = vmul.f32 %v531_v48, %v2093_v1  ;;  %v537_v55 = vmul.f32 %v2099_v4, %v535_v49  ;;  %s2295_s29 = sld [smem:[#allocation3 + $0xe]] }
  0x6b   : > { %1265 = vrot.lane.b32.xlu1 %v1260_v32, %s1947_s11  ;;  %v261_v46 = vadd.f32 %v259_v40, %v255_v44  ;;  %1716 = vmatpush3.bf16.msra.mxu0 %v2192_v26  ;;  %v538_v56 = vadd.f32 %v536_v51, %v532_v50  ;;  %v542_v57 = vmul.f32 %v2101_v5, %v541_v52  ;;  %v818_v8 = vstv %s2223_s5  ;;  %s2297_s5 = sld [smem:[#allocation3 + $0x1e]] }
  0x6c   : > { %v262_v47 = vadd.f32 %v260_v43, %v256_v45  ;;  %1726 = vmatprep.subr.bf16.mxu0 %v2188_v22  ;;  %v548_v58 = vmul.f32 %v2109_v10, %v547_v53  ;;  %v539_v59 = vadd.f32 %v537_v55, %v533_v54  ;;  %v543_v60 = vmul.f32 %v2103_v6, %v541_v52 }
  0x6d   : > { %265 = vrot.lane.b32.xlu0 %v261_v46, %s1947_s11  ;;  %v549_v61 = vmul.f32 %v2111_v11, %v547_v53  ;;  %v544_v62 = vadd.f32 %v542_v57, %v538_v56  ;;  %v819_v9 = vmul.f32 %v818_v8, %v2091_v0  ;;  %v822_v12 = vstv %s1528_s6  ;;  %s2299_s6 = sld [smem:[#allocation3]] }
  0x6e   : > { %v545_v63 = vadd.f32 %v543_v60, %v539_v59  ;;  %v828_v13 = vstv %s1529_s7  ;;  %v823_v14 = vmul.f32 %v2095_v2, %v822_v12  ;;  %v834_v16 = vstv %s1530_s10  ;;  %s2301_s7 = sld [smem:[#allocation3 + $0x10]]  ;;  %s2310_s10 = sld [smem:[#allocation3 + $0x2e]] }
  0x6f   : > { %267 = vrot.lane.b32.xlu1 %v262_v47, %s1947_s11  ;;  %v550_v3 = vadd.f32 %v548_v58, %v544_v62  ;;  %v829_v15 = vmul.f32 %v2101_v5, %v828_v13  ;;  %v820_v17 = vmul.f32 %v818_v8, %v2093_v1  ;;  %v824_v18 = vmul.f32 %v2099_v4, %v822_v12 }
  0x70   : > { %v551_v7 = vadd.f32 %v549_v61, %v545_v63  ;;  %v825_v19 = vadd.f32 %v823_v14, %v819_v9  ;;  %v835_v20 = vmul.f32 %v2109_v10, %v834_v16  ;;  %v830_v21 = vmul.f32 %v2103_v6, %v828_v13 }
  0x71   : > { %554 = vrot.lane.b32.xlu0 %v550_v3, %s1947_s11  ;;  %v826_v23 = vadd.f32 %v824_v18, %v820_v17  ;;  %v836_v24 = vmul.f32 %v2111_v11, %v834_v16  ;;  %v1105_v28 = vstv %s2231_s12  ;;  %v1109_v32 = vstv %s2235_s13  ;;  %s2312_s12 = sld [smem:[#allocation3 + $0x20]]  ;;  %s2317_s13 = sld [smem:[#allocation3 + $0x3e]] }
  0x72   : > { %v831_v25 = vadd.f32 %v829_v15, %v825_v19  ;;  %v1106_v30 = vmul.f32 %v1105_v28, %v2091_v0  ;;  %v1115_v33 = vstv %s1552_s14  ;;  %v1121_v34 = vstv %s1553_s16  ;;  %s2327_s14 = sld [smem:[#allocation3 + $0x30]]  ;;  %s2335_s16 = sld [smem:[#allocation3 + $0x4]] }
  0x73   : > { %556 = vrot.lane.b32.xlu1 %v551_v7, %s1947_s11  ;;  %v832_v27 = vadd.f32 %v830_v21, %v826_v23  ;;  %v1110_v35 = vmul.f32 %v2095_v2, %v1109_v32  ;;  %v1116_v36 = vmul.f32 %v2101_v5, %v1115_v33  ;;  %v1107_v37 = vmul.f32 %v1105_v28, %v2093_v1 }
  0x74   : > { %v837_v29 = vadd.f32 %v835_v20, %v831_v25  ;;  %v1111_v38 = vmul.f32 %v2099_v4, %v1109_v32  ;;  %v1117_v39 = vmul.f32 %v2103_v6, %v1115_v33  ;;  %v1122_v41 = vmul.f32 %v2109_v10, %v1121_v34 }
  0x75   : > { %v838_v31 = vadd.f32 %v836_v24, %v832_v27  ;;  %v1112_v40 = vadd.f32 %v1110_v35, %v1106_v30  ;;  %v1123_v43 = vmul.f32 %v2111_v11, %v1121_v34  ;;  %v357_v48 = vstv %s1490_s20  ;;  %s2337_s20 = sld [smem:[#allocation3 + $0x14]] }
  0x76   : > { %841 = vrot.lane.b32.xlu0 %v837_v29, %s1947_s11  ;;  %v1113_v42 = vadd.f32 %v1111_v38, %v1107_v37  ;;  %v361_v49 = vstv %s1491_s21  ;;  %v358_v50 = vmul.f32 %v357_v48, %v2091_v0  ;;  %v367_v52 = vstv %s1492_s22  ;;  %s2352_s21 = sld [smem:[#allocation3 + $0x24]] }
  0x77   : > { %843 = vrot.lane.b32.xlu1 %v838_v31, %s1947_s11  ;;  %v1118_v44 = vadd.f32 %v1116_v36, %v1112_v40  ;;  %v362_v51 = vmul.f32 %v2095_v2, %v361_v49  ;;  %v644_v53 = vstv %s2260_s18  ;;  %v648_v54 = vstv %s2262_s15  ;;  %s2367_s22 = sld [smem:[#allocation3 + $0x34]]  ;;  %s2373_s18 = sld [smem:[#allocation3 + $0x8]] }
  0x78   : > { %v1119_v45 = vadd.f32 %v1117_v39, %v1113_v42  ;;  %v373_v55 = vstv %s2264_s17  ;;  %v368_v57 = vmul.f32 %v2101_v5, %v367_v52  ;;  %v649_v58 = vmul.f32 %v2095_v2, %v648_v54  ;;  %s2375_s15 = sld [smem:[#allocation3 + $0x18]] }
  0x79   : > { %v1124_v46 = vadd.f32 %v1122_v41, %v1118_v44  ;;  %v364_v56 = vadd.f32 %v362_v51, %v358_v50  ;;  %v645_v59 = vmul.f32 %v644_v53, %v2091_v0  ;;  %v359_v60 = vmul.f32 %v357_v48, %v2093_v1  ;;  %s2386_s17 = sld [smem:[#allocation3 + $0x28]] }
  0x7a   : > { %v1125_v47 = vadd.f32 %v1123_v43, %v1119_v45  ;;  %v363_v61 = vmul.f32 %v2099_v4, %v361_v49  ;;  %v654_v62 = vstv %s2266_s19  ;;  %v374_v63 = vmul.f32 %v2109_v10, %v373_v55  ;;  %s2396_s19 = sld [smem:[#allocation3 + $0x38]] }
  0x7b   : > { %1128 = vrot.lane.b32.xlu0 %v1124_v46, %s1947_s11  ;;  %v370_v3 = vadd.f32 %v368_v57, %v364_v56  ;;  %v369_v7 = vmul.f32 %v2103_v6, %v367_v52  ;;  %v655_v8 = vmul.f32 %v2101_v5, %v654_v62  ;;  %v651_v9 = vadd.f32 %v649_v58, %v645_v59 }
  0x7c   : > { %1130 = vrot.lane.b32.xlu1 %v1125_v47, %s1947_s11  ;;  %s2270_s11 = sld [smem:[#allocation3 + $0x36]]  ;;  %v365_v12 = vadd.f32 %v363_v61, %v359_v60  ;;  %v931_v14 = vstv %s2274_s23  ;;  %v935_v15 = vstv %s2276_s0  ;;  %v646_v16 = vmul.f32 %v644_v53, %v2093_v1  ;;  %s2405_s23 = sld [smem:[#allocation3 + $0x1c]] }
  0x7d   : > { %v650_v17 = vmul.f32 %v2099_v4, %v648_v54  ;;  %v657_v19 = vadd.f32 %v655_v8, %v651_v9  ;;  %v932_v20 = vmul.f32 %v931_v14, %v2091_v0  ;;  %v936_v21 = vmul.f32 %v2095_v2, %v935_v15  ;;  %s2420_s0 = sld [smem:[#allocation3 + $0x2c]] }
  0x7e   : > { %v376_v23 = vadd.f32 %v374_v63, %v370_v3  ;;  %v371_v24 = vadd.f32 %v369_v7, %v365_v12  ;;  %v375_v25 = vmul.f32 %v2111_v11, %v373_v55  ;;  %v941_v27 = vstv %s2285_s8  ;;  %s2432_s8 = sld [smem:[#allocation3 + $0x3c]] }
  0x7f   : > { %v652_v28 = vadd.f32 %v650_v17, %v646_v16  ;;  %v656_v29 = vmul.f32 %v2103_v6, %v654_v62  ;;  %v938_v32 = vadd.f32 %v936_v21, %v932_v20  ;;  %v942_v33 = vmul.f32 %v2101_v5, %v941_v27 }
  0x80   : > { %v947_v34 = vstv %s2290_s1  ;;  %v377_v36 = vadd.f32 %v375_v25, %v371_v24  ;;  %v1218_v37 = vstv %s2295_s29  ;;  %v1222_v38 = vstv %s2297_s5  ;;  %s1948_s1 = smov 32   ;;  %s501_s29 = sld [smem:[#allocation4]] }
  0x81   : > { %v933_v39 = vmul.f32 %v931_v14, %v2093_v1  ;;  %v937_v40 = vmul.f32 %v2099_v4, %v935_v15  ;;  %v220_v41 = vstv %s2299_s6  ;;  %v224_v42 = vstv %s2301_s7  ;;  %s1572_s5 = sshll.u32 %s2530_s26, 6  ;;  %s1520_s6 = sld [smem:[#allocation4 + $0x1]] }
  0x82   : > { %v660_v13 = vstv %s2270_s11  ;;  %v658_v44 = vadd.f32 %v656_v29, %v652_v28  ;;  %v948_v46 = vmul.f32 %v2109_v10, %v947_v34  ;;  %v943_v47 = vmul.f32 %v2103_v6, %v941_v27  ;;  %s2403_s11 = sld [smem:[#allocation3 + $0xc]]  ;;  %s1543_s26 = sld [smem:[#allocation4 + $0x2]] }
  0x83   : > { %v661_v18 = vmul.f32 %v2109_v10, %v660_v13  ;;  %v662_v45 = vmul.f32 %v2111_v11, %v660_v13  ;;  %v944_v50 = vadd.f32 %v942_v33, %v938_v32  ;;  %v1219_v51 = vmul.f32 %v1218_v37, %v2091_v0 }
  0x84   : > { %v1223_v52 = vmul.f32 %v2095_v2, %v1222_v38  ;;  %v1228_v54 = vstv %s2310_s10  ;;  %v221_v55 = vmul.f32 %v220_v41, %v2091_v0  ;;  %v225_v56 = vmul.f32 %v2095_v2, %v224_v42 }
  0x85   : > { %v663_v31 = vadd.f32 %v661_v18, %v657_v19  ;;  %v939_v57 = vadd.f32 %v937_v40, %v933_v39  ;;  %v222_v58 = vmul.f32 %v220_v41, %v2093_v1  ;;  %v226_v59 = vmul.f32 %v2099_v4, %v224_v42 }
  0x86   : > { %v230_v60 = vstv %s2312_s12  ;;  %v664_v61 = vadd.f32 %v662_v45, %v658_v44  ;;  %v950_v63 = vadd.f32 %v948_v46, %v944_v50  ;;  %v1225_v3 = vadd.f32 %v1223_v52, %v1219_v51  ;;  %s2470_s12 = scalar_lea.vmem %s2517_s4, %s1572_s5 }
  0x87   : > { %v1229_v7 = vmul.f32 %v2101_v5, %v1228_v54  ;;  %v1234_v8 = vstv %s2317_s13  ;;  %v949_v12 = vmul.f32 %v2111_v11, %v947_v34  ;;  %v227_v13 = vadd.f32 %v225_v56, %v221_v55  ;;  %s1566_s13 = sld [smem:[#allocation4 + $0x3]] }
  0x88   : > { %v231_v14 = vmul.f32 %v2101_v5, %v230_v60  ;;  %v945_v15 = vadd.f32 %v943_v47, %v939_v57  ;;  %v228_v16 = vadd.f32 %v226_v59, %v222_v58  ;;  %v232_v17 = vmul.f32 %v2103_v6, %v230_v60 }
  0x89   : > { %v236_v18 = vstv %s2327_s14  ;;  %v1235_v20 = vmul.f32 %v2109_v10, %v1234_v8  ;;  %v1220_v21 = vmul.f32 %v1218_v37, %v2093_v1  ;;  %v1231_v25 = vadd.f32 %v1229_v7, %v1225_v3 }
  0x8a   : > { %v509_v27 = vstv %s2335_s16  ;;  %v513_v28 = vstv %s2337_s20  ;;  %v951_v32 = vadd.f32 %v949_v12, %v945_v15  ;;  %v1230_v33 = vmul.f32 %v2103_v6, %v1228_v54 }
  0x8b   : > { %v234_v34 = vadd.f32 %v232_v17, %v228_v16  ;;  %v510_v37 = vmul.f32 %v509_v27, %v2091_v0  ;;  %v1237_v39 = vadd.f32 %v1235_v20, %v1231_v25  ;;  %v519_v41 = vstv %s2352_s21 }
  0x8c   : > { %v511_v42 = vmul.f32 %v509_v27, %v2093_v1  ;;  %v1236_v46 = vmul.f32 %v2111_v11, %v1234_v8  ;;  %v520_v51 = vmul.f32 %v2101_v5, %v519_v41  ;;  %v525_v54 = vstv %s2367_s22 }
  0x8d   : > { %v521_v56 = vmul.f32 %v2103_v6, %v519_v41  ;;  %v796_v60 = vstv %s2373_s18  ;;  %v526_v3 = vmul.f32 %v2109_v10, %v525_v54  ;;  %v527_v8 = vmul.f32 %v2111_v11, %v525_v54 }
  0x8e   : > { %v1083_v27 = vstv %s2403_s11 }
  0xce   : > { %v403_v30 = vpop.permute.xlu0 %402 }
  0xcf   : > { %v408_v35 = vsel %vm271_vm0, %v376_v23, %v403_v30  ;;  %v1224_v23 = vmul.f32 %v2099_v4, %v1222_v38  ;;  %v233_v30 = vadd.f32 %v231_v14, %v227_v13  ;;  %v514_v38 = vmul.f32 %v2095_v2, %v513_v28 }
  0xd0   : > { %1640 = vmatprep.mubr.msk.f32.mxu1 %vm274_vm1, %v408_v35  ;;  %v238_v35 = vmul.f32 %v2111_v11, %v236_v18  ;;  %v806_v13 = vstv %s2386_s17  ;;  %v798_v14 = vmul.f32 %v796_v60, %v2093_v1 }
  0xd1   : > { %v690_v43 = vpop.permute.xlu1 %689  ;;  %v516_v50 = vadd.f32 %v514_v38, %v510_v37  ;;  %v807_v20 = vmul.f32 %v2101_v5, %v806_v13  ;;  %v808_v25 = vmul.f32 %v2103_v6, %v806_v13  ;;  %v1093_v38 = vstv %s2420_s0 }
  0xd2   : > { %v405_v48 = vpop.permute.xlu0 %404  ;;  %v695_v49 = vsel %vm271_vm0, %v663_v31, %v690_v43  ;;  %v237_v31 = vmul.f32 %v2109_v10, %v236_v18  ;;  %v515_v43 = vmul.f32 %v2099_v4, %v513_v28  ;;  %v240_v47 = vadd.f32 %v238_v35, %v234_v34 }
  0xd3   : > { %v409_v53 = vsel %vm271_vm0, %v377_v36, %v405_v48  ;;  %v1226_v36 = vadd.f32 %v1224_v23, %v1220_v21  ;;  %v812_v21 = vstv %s2396_s19  ;;  %v1087_v28 = vstv %s2405_s23 }
  0xd4   : > { %1641 = vmatmul.mubr.msk.f32.vlgmr.msra.gmra.mrb[0].mxu1 %vm274_vm1, %v409_v53  ;;  %v239_v45 = vadd.f32 %v237_v31, %v233_v30  ;;  %v517_v55 = vadd.f32 %v515_v43, %v511_v42  ;;  %v814_v34 = vmul.f32 %v2111_v11, %v812_v21  ;;  %v1084_v35 = vmul.f32 %v1083_v27, %v2091_v0 }
  0xd5   : > { %1736 = vmatpush3.bf16.msra.mxu1 %v2188_v22  ;;  %1662 = vmatprep.mubr.msk.f32.mxu1 %vm274_vm1, %v695_v49  ;;  %v692_v62 = vpop.permute.xlu1 %691  ;;  %v1232_v49 = vadd.f32 %v1230_v33, %v1226_v36  ;;  %v1088_v36 = vmul.f32 %v2095_v2, %v1087_v28  ;;  %v1094_v43 = vmul.f32 %v2101_v5, %v1093_v38 }
  0xd6   : > { %1738 = vmatprep.subr.bf16.mxu1 %v2192_v26  ;;  %v977_v9 = vpop.permute.xlu0 %976  ;;  %v696_v19 = vsel %vm271_vm0, %v664_v61, %v692_v62  ;;  %v800_v61 = vstv %s2375_s15  ;;  %v523_v7 = vadd.f32 %v521_v56, %v517_v55 }
  0xd7   : > { %v982_v24 = vsel %vm271_vm0, %v950_v63, %v977_v9  ;;  %v1238_v62 = vadd.f32 %v1236_v46, %v1232_v49  ;;  %v522_v63 = vadd.f32 %v520_v51, %v516_v50  ;;  %v797_v9 = vmul.f32 %v796_v60, %v2091_v0 }
  0xd8   : > { %v801_v12 = vmul.f32 %v2095_v2, %v800_v61  ;;  %v802_v15 = vmul.f32 %v2099_v4, %v800_v61  ;;  %v529_v18 = vadd.f32 %v527_v8, %v523_v7  ;;  %v1090_v42 = vadd.f32 %v1088_v36, %v1084_v35 }
  0xd9   : > { %1740 = vmatpush3.bf16.msra.mxu1 %v2192_v26  ;;  %v979_v29 = vpop.permute.xlu1 %978  ;;  %v528_v17 = vadd.f32 %v526_v3, %v522_v63  ;;  %v1099_v0 = vstv %s2432_s8  ;;  %v1095_v2 = vmul.f32 %v2103_v6, %v1093_v38  ;;  %v1363_v35 = vstv %s1566_s13 }
  0xda   : > { %1750 = vmatprep.subr.bf16.mxu1 %v2188_v22  ;;  %v1264_v40 = vpop.permute.xlu0 %1263  ;;  %v983_v48 = vsel %vm271_vm0, %v951_v32, %v979_v29  ;;  %v813_v32 = vmul.f32 %v2109_v10, %v812_v21  ;;  %v1101_v50 = vmul.f32 %v2111_v11, %v1099_v0 }
  0xdb   : > { %v1269_v52 = vsel %vm271_vm0, %v1237_v39, %v1264_v40  ;;  %v1085_v39 = vmul.f32 %v1083_v27, %v2093_v1  ;;  %v1089_v40 = vmul.f32 %v2099_v4, %v1087_v28  ;;  %v1096_v4 = vadd.f32 %v1094_v43, %v1090_v42 }
  0xdc   : > { %1663 = vmatmul.mubr.msk.f32.vlgmr.msra.gmra.mrb[2].mxu1 %vm274_vm1, %v696_v19  ;;  %v803_v19 = vadd.f32 %v801_v12, %v797_v9  ;;  %v502_v12 = vstv %s501_s29  ;;  %v1076_v28 = vstv %s1543_s26 }
  0xdd   : > { %1752 = vmatpush3.bf16.msra.mxu1 %v2188_v22  ;;  %1684 = vmatprep.mubr.msk.f32.mxu1 %vm274_vm1, %v982_v24  ;;  %v1266_v44 = vpop.permute.xlu1 %1265  ;;  %v804_v24 = vadd.f32 %v802_v15, %v798_v14 }
  0xde   : > { %1754 = vmatprep.subr.bf16.mxu1 %v2192_v26  ;;  %v1270_v16 = vsel %vm271_vm0, %v1238_v62, %v1266_v44  ;;  %v809_v33 = vadd.f32 %v807_v20, %v803_v19  ;;  %v789_v19 = vstv %s1520_s6 }
  0xdf   : > { %v266_v53 = vpop.permute.xlu0 %265  ;;  %v810_v37 = vadd.f32 %v808_v25, %v804_v24 }
  0xe0   : > { %v272_v58 = vsel %vm271_vm0, %v239_v45, %v266_v53  ;;  %v815_v41 = vadd.f32 %v813_v32, %v809_v33  ;;  %v1091_v45 = vadd.f32 %v1089_v40, %v1085_v39 }
  0xe1   : > { %1756 = vmatpush3.bf16.msra.mxu1 %v2192_v26  ;;  %v268_v57 = vpop.permute.xlu1 %267  ;;  %1629 = vmatprep.mubr.msk.f32.mxu0 %vm274_vm1, %v272_v58  ;;  %v816_v44 = vadd.f32 %v814_v34, %v810_v37 }
  0xe2   : > { %1766 = vmatprep.subr.bf16.mxu1 %v2188_v22  ;;  %v273_v59 = vsel %vm271_vm0, %v240_v47, %v268_v57  ;;  %v1097_v5 = vadd.f32 %v1095_v2, %v1091_v45 }
  0xe3   : > { %1630 = vmatmul.mubr.msk.f32.vlgmr.msra.gmra.mrb[0].mxu0 %vm274_vm1, %v273_v59  ;;  %v555_v23 = vpop.permute.xlu0 %554 }
  0xe4   : > { %1685 = vmatmul.mubr.msk.f32.vlgmr.msra.gmra.mrb[4].mxu1 %vm274_vm1, %v983_v48  ;;  %1728 = vmatpush3.bf16.msra.mxu0 %v2188_v22  ;;  %v560_v29 = vsel %vm271_vm0, %v528_v17, %v555_v23  ;;  %v1100_v48 = vmul.f32 %v2109_v10, %v1099_v0  ;;  %v1103_v51 = vadd.f32 %v1101_v50, %v1097_v5 }
  0xe5   : > { %1768 = vmatpush3.bf16.msra.mxu1 %v2188_v22  ;;  %1706 = vmatprep.mubr.msk.f32.mxu1 %vm274_vm1, %v1269_v52  ;;  %v557_v30 = vpop.permute.xlu1 %556 }
  0xe6   : > { %1770 = vmatprep.subr.bf16.mxu1 %v2192_v26  ;;  %1730 = vmatprep.subr.bf16.mxu0 %v2192_v26  ;;  %v561_v31 = vsel %vm271_vm0, %v529_v18, %v557_v30  ;;  %v1102_v6 = vadd.f32 %v1100_v48, %v1096_v4 }
  0xe7   : > { %1651 = vmatprep.mubr.msk.f32.mxu0 %vm274_vm1, %v560_v29 }
  0xe8   : > { %1732 = vmatpush3.bf16.msra.mxu0 %v2192_v26  ;;  %v842_v46 = vpop.permute.xlu0 %841 }
  0xe9   : > { %1772 = vmatpush3.bf16.msra.mxu1 %v2192_v26  ;;  %1742 = vmatprep.subr.bf16.mxu0 %v2188_v22  ;;  %v847_v1 = vsel %vm271_vm0, %v815_v41, %v842_v46  ;;  %v844_v47 = vpop.permute.xlu1 %843 }
  0xea   : > { %v848_v49 = vsel %vm271_vm0, %v816_v44, %v844_v47 }
  0xeb   : > { %1652 = vmatmul.mubr.msk.f32.vlgmr.msra.gmra.mrb[2].mxu0 %vm274_vm1, %v561_v31 }
  0xec   : > { %1707 = vmatmul.mubr.msk.f32.vlgmr.msra.gmra.mrb[6].mxu1 %vm274_vm1, %v1270_v16  ;;  %1744 = vmatpush3.bf16.msra.mxu0 %v2188_v22 }
  0xed   : > { %1746 = vmatprep.subr.bf16.mxu0 %v2192_v26  ;;  %1673 = vmatprep.mubr.msk.f32.mxu0 %vm274_vm1, %v847_v1  ;;  %v1129_v52 = vpop.permute.xlu0 %1128 }
  0xee   : > { %v1134_v10 = vsel %vm271_vm0, %v1102_v6, %v1129_v52  ;;  %v1131_v53 = vpop.permute.xlu1 %1130 }
  0xef   : > { %v1135_v54 = vsel %vm271_vm0, %v1103_v51, %v1131_v53 }
  0xf0   : > { %1748 = vmatpush3.bf16.msra.mxu0 %v2192_v26 }
  0xf1   : > { %1758 = vmatprep.subr.bf16.mxu0 %v2188_v22 }
  0xf3   : > { %1674 = vmatmul.mubr.msk.f32.vlgmr.msra.gmra.mrb[4].mxu0 %vm274_vm1, %v848_v49 }
  0xf4   : > { %1760 = vmatpush3.bf16.msra.mxu0 %v2188_v22  ;;  %1695 = vmatprep.mubr.msk.f32.mxu0 %vm274_vm1, %v1134_v10 }
  0xf5   : > { %1762 = vmatprep.subr.bf16.mxu0 %v2192_v26 }
  0xf8   : > { %1764 = vmatpush3.bf16.msra.mxu0 %v2192_v26 }
  0xfb   : > { %1696 = vmatmul.mubr.msk.f32.vlgmr.msra.gmra.mrb[6].mxu0 %vm274_vm1, %v1135_v54 }
 0x1a7   : > { %v1642_v11 = vpop.f32.mrb[0].mxu1 }
 0x1a8   : > { %495 = vrot.lane.b32.xlu1 %v1642_v11, %s1948_s1  ;;  %v482_v22 = vpop.f32.mrb[1].mxu1 }
 0x1a9   : > { %493 = vrot.lane.b32.xlu0 %v482_v22, %s1948_s1 }
 0x1af   : > { %v1664_v55 = vpop.f32.mrb[2].mxu1 }
 0x1b0   : > { %v769_v56 = vpop.f32.mrb[3].mxu1  ;;  %782 = vrot.lane.b32.xlu1 %v1664_v55, %s1948_s1 }
 0x1b1   : > { %780 = vrot.lane.b32.xlu0 %v769_v56, %s1948_s1 }
 0x1b6   : > { %v1631_v58 = vpop.f32.mrb[0].mxu0 }
 0x1b7   : > { %v1686_v57 = vpop.f32.mrb[4].mxu1  ;;  %v347_v59 = vpop.f32.mrb[1].mxu0 }
 0x1b8   : > { %v1056_v26 = vpop.f32.mrb[5].mxu1  ;;  %1069 = vrot.lane.b32.xlu1 %v1686_v57, %s1948_s1 }
 0x1b9   : > { %1067 = vrot.lane.b32.xlu0 %v1056_v26, %s1948_s1 }
 0x1be   : > { %v1653_v62 = vpop.f32.mrb[2].mxu0 }
 0x1bf   : > { %v1708_v60 = vpop.f32.mrb[6].mxu1  ;;  %v634_v63 = vpop.f32.mrb[3].mxu0 }
 0x1c0   : > { %1356 = vrot.lane.b32.xlu1 %v1708_v60, %s1948_s1  ;;  %v1343_v61 = vpop.f32.mrb[7].mxu1 }
 0x1c1   : > { %1354 = vrot.lane.b32.xlu0 %v1343_v61, %s1948_s1 }
 0x1c6   : > { %v1675_v3 = vpop.f32.mrb[4].mxu0 }
 0x1c7   : > { %v921_v7 = vpop.f32.mrb[5].mxu0 }
 0x1ce   : > { %v1697_v8 = vpop.f32.mrb[6].mxu0 }
 0x1cf   : > { %v1208_v9 = vpop.f32.mrb[7].mxu0 }
 0x21a   : > { %v496_v13 = vpop.permute.xlu1 %495 }
 0x21b   : > { %v500_v14 = vsel %vm274_vm1, %v1631_v58, %v496_v13  ;;  %v494_v15 = vpop.permute.xlu0 %493 }
 0x21c   : > { %v504_v16 = vadd.f32 %v502_v12, %v500_v14  ;;  %v499_v17 = vsel %vm274_vm1, %v347_v59, %v494_v15 }
 0x21d   : > { %v503_v18 = vadd.f32 %v502_v12, %v499_v17 }
 0x21e   : > { %507 = vst.msk [vmem:[%s2470_s12 + $0x8] sm:$0xff] %vm505_vm2, %v504_v16 }
 0x21f   : > { %506 = vst.msk [vmem:[%s2470_s12] sm:$0xff] %vm505_vm2, %v503_v18 }
 0x222   : > { %v783_v20 = vpop.permute.xlu1 %782 }
 0x223   : > { %v787_v21 = vsel %vm274_vm1, %v1653_v62, %v783_v20  ;;  %v781_v23 = vpop.permute.xlu0 %780 }
 0x224   : > { %v791_v24 = vadd.f32 %v789_v19, %v787_v21  ;;  %v786_v25 = vsel %vm274_vm1, %v634_v63, %v781_v23 }
 0x225   : > { %v790_v27 = vadd.f32 %v789_v19, %v786_v25 }
 0x226   : > { %1522 = vst.msk [vmem:[%s2470_s12 + $0x18] sm:$0xff] %vm505_vm2, %v791_v24 }
 0x227   : > { %1521 = vst.msk [vmem:[%s2470_s12 + $0x10] sm:$0xff] %vm505_vm2, %v790_v27 }
 0x22a   : > { %v1070_v29 = vpop.permute.xlu1 %1069 }
 0x22b   : > { %v1074_v30 = vsel %vm274_vm1, %v1675_v3, %v1070_v29  ;;  %v1068_v31 = vpop.permute.xlu0 %1067 }
 0x22c   : > { %v1078_v32 = vadd.f32 %v1076_v28, %v1074_v30  ;;  %v1073_v33 = vsel %vm274_vm1, %v921_v7, %v1068_v31 }
 0x22d   : > { %v1077_v34 = vadd.f32 %v1076_v28, %v1073_v33 }
 0x22e   : > { %1545 = vst.msk [vmem:[%s2470_s12 + $0x28] sm:$0xff] %vm505_vm2, %v1078_v32 }
 0x22f   : > { %1544 = vst.msk [vmem:[%s2470_s12 + $0x20] sm:$0xff] %vm505_vm2, %v1077_v34 }
 0x232   : > { %v1357_v36 = vpop.permute.xlu1 %1356 }
 0x233   : > { %v1361_v37 = vsel %vm274_vm1, %v1697_v8, %v1357_v36  ;;  %v1355_v38 = vpop.permute.xlu0 %1354 }
 0x234   : > { %v1365_v39 = vadd.f32 %v1363_v35, %v1361_v37  ;;  %v1360_v40 = vsel %vm274_vm1, %v1208_v9, %v1355_v38 }
 0x235   : > { %v1364_v41 = vadd.f32 %v1363_v35, %v1360_v40 }
 0x236   : > { %1568 = vst.msk [vmem:[%s2470_s12 + $0x38] sm:$0xff] %vm505_vm2, %v1365_v39 }
 0x237   : > { %1567 = vst.msk [vmem:[%s2470_s12 + $0x30] sm:$0xff] %vm505_vm2, %v1364_v41 }
 0x238 PF: > { %s27_s28 = sadd.s32 1, %s1940_s28   ;;  %s2522_s1 = smov %s1924_s24 }
 0x239   : > { %p24_p5 = scmp.ge.s32.totalorder %s27_s28, 4   ;;  %s2523_s24 = smov %s1928_s25 }
 0x23a   : > { %s2524_s25 = smov %s2029_s9  ;;  %s2525_s26 = smov %s1936_s27 }
 0x23b   : > { %s2526_s27 = smov %s2528_s30  ;;  %26 = sbr.rel (!%p24_p5) target bundleno = 29 (0x1d), region = 74 }
 0x242   :  { %1399 = vsyncpa [#allocation6], 1 }
 0x243   :  { %1401 = vsyncpa [#allocation6 + $0x1], 1 }

</bundles_post_ra>
